<compile_context>
chip_gen: v5e
topology: v5e:2x2
jax: 0.10.0
libtpu: 0.0.40
codegen_flags: <defaults>
</compile_context>

<pallas_src>
import functools

import jax
import jax.numpy as jnp
from jax.experimental import pallas as pl
from jax.experimental.pallas import tpu as pltpu

_LN_EPS = 1e-5  # torch.nn.LayerNorm default


def _layer_norm(x, w, b):
    mu = jnp.mean(x, axis=-1, keepdims=True)
    var = jnp.mean(jnp.square(x - mu), axis=-1, keepdims=True)
    return (x - mu) * jax.lax.rsqrt(var + _LN_EPS) * w + b


# ---------------------------- kernels ----------------------------

def transformer_kernel(x_ref, pos_ref, mask_ref,
                       ln1_w_ref, ln1_b_ref, wqkv_ref, bqkv_ref,
                       wo_ref, bo_ref, ln2_w_ref, ln2_b_ref,
                       wfc_ref, bfc_ref, wpr_ref, bpr_ref,
                       o_ref, attn_scr, *, n_head, bt, compute_dtype):
    """All L CLIP ResidualAttentionBlocks; one (batch_block, layer) grid step."""
    S, D = pos_ref.shape
    hd = D // n_head
    scale = 1.0 / float(hd) ** 0.5
    layer = pl.program_id(1)

    # Fold positional-embedding add into the first layer of each batch block.
    @pl.when(layer == 0)
    def _():
        o_ref[...] = x_ref[...] + pos_ref[...][None, :, :]

    # Residual stream lives in the resident output block (f32).
    x = o_ref[...].reshape(bt * S, D)

    # --- multi-head self-attention ---
    h = _layer_norm(x, ln1_w_ref[...], ln1_b_ref[...]).astype(compute_dtype)
    # Fused lane-dense QKV projection: (M, D) @ (D, 3D), f32 accumulate.
    qkv = jnp.dot(h, wqkv_ref[...],
                  preferred_element_type=jnp.float32) + bqkv_ref[...]
    mask = mask_ref[...]                                 # (S, S) additive causal
    for b in range(bt):                                  # static, unrolled
        r0 = b * S
        for hh in range(n_head):
            c0 = hh * hd
            qh = qkv[r0:r0 + S, c0:c0 + hd].astype(compute_dtype)
            kh = qkv[r0:r0 + S, D + c0:D + c0 + hd].astype(compute_dtype)
            vh = qkv[r0:r0 + S, 2 * D + c0:2 * D + c0 + hd].astype(compute_dtype)
            s = jax.lax.dot_general(qh, kh, (((1,), (1,)), ((), ())),
                                    preferred_element_type=jnp.float32)
            s = s * scale + mask
            s = s - jnp.max(s, axis=-1, keepdims=True)
            p = jnp.exp(s)
            p = p * pl.reciprocal(jnp.sum(p, axis=-1, keepdims=True), approx=True)
            oh = jnp.dot(p.astype(compute_dtype), vh,
                         preferred_element_type=jnp.float32)        # (S, hd)
            attn_scr[r0:r0 + S, c0:c0 + hd] = oh                    # concat heads
    # Single dense out-projection over the concatenated heads.
    attn = jnp.dot(attn_scr[...].astype(compute_dtype), wo_ref[...],
                   preferred_element_type=jnp.float32) + bo_ref[...]
    x = x + attn

    # --- MLP with QuickGELU ---
    h2 = _layer_norm(x, ln2_w_ref[...], ln2_b_ref[...]).astype(compute_dtype)
    m = jnp.dot(h2, wfc_ref[...],
                preferred_element_type=jnp.float32) + bfc_ref[...]
    m = m * jax.nn.sigmoid(1.702 * m)                    # QuickGELU (f32)
    m = jnp.dot(m.astype(compute_dtype), wpr_ref[...],
                preferred_element_type=jnp.float32) + bpr_ref[...]

    o_ref[...] = (x + m).reshape(bt, S, D).astype(o_ref.dtype)


def final_kernel(eot_ref, x_ref, lnf_w_ref, lnf_b_ref, proj_ref, o_ref,
                 *, batch, compute_dtype):
    """Gather B EOT rows (dynamic slices), ln_final on those rows, one matmul."""
    rows = []
    for b in range(batch):                               # static, unrolled
        idx = eot_ref[b]                                 # SMEM scalar prefetch
        rows.append(x_ref[b, pl.ds(idx, 1), :])          # (1, D) dynamic row
    sel = jnp.concatenate(rows, axis=0)                  # (B, D)
    lnx = _layer_norm(sel, lnf_w_ref[...], lnf_b_ref[...]).astype(compute_dtype)
    o_ref[...] = jnp.dot(lnx, proj_ref[...],
                         preferred_element_type=jnp.float32).astype(o_ref.dtype)


# ---------------------------- wrappers ----------------------------

def _pick_batch_tile(B, S, target_rows=256):
    """Largest divisor-of-B batch tile targeting ~target_rows matmul rows,
    while keeping >=2 batch blocks when possible (feeds both v7x TensorCores)."""
    bt = max(1, min(B, target_rows // max(S, 1)))
    while B % bt:
        bt -= 1
    if B // bt < 2 and B > 1:
        bt = B // 2
        while B % bt:
            bt -= 1
    return bt


def transformer_forward(x, params, n_head, *, compute_dtype=jnp.bfloat16):
    B, S, D = x.shape
    L = params["w_qkv"].shape[0]
    F = params["w_fc"].shape[-1]
    bt = _pick_batch_tile(B, S)
    n_bb = B // bt

    def wspec(shape):      # per-layer stacked weight, streamed along layer axis
        nd = len(shape)
        return pl.BlockSpec((None,) + shape, lambda b, l, _nd=nd: (l,) + (0,) * _nd)

    def cspec(shape):      # grid-invariant constant
        nd = len(shape)
        return pl.BlockSpec(shape, lambda b, l, _nd=nd: (0,) * _nd)

    in_specs = [
        pl.BlockSpec((bt, S, D), lambda b, l: (b, 0, 0)),   # x (only read at l==0)
        cspec((S, D)),                                      # positional embedding
        cspec((S, S)),                                      # causal mask
        wspec((1, D)), wspec((1, D)),                       # ln_1
        wspec((D, 3 * D)), wspec((1, 3 * D)),               # fused QKV
        wspec((D, D)), wspec((1, D)),                       # out-proj
        wspec((1, D)), wspec((1, D)),                       # ln_2
        wspec((D, F)), wspec((1, F)),                       # mlp c_fc
        wspec((F, D)), wspec((1, D)),                       # mlp c_proj
    ]
    grid_spec = pltpu.PrefetchScalarGridSpec(
        num_scalar_prefetch=0,
        grid=(n_bb, L),
        in_specs=in_specs,
        out_specs=pl.BlockSpec((bt, S, D), lambda b, l: (b, 0, 0)),
        scratch_shapes=[pltpu.VMEM((bt * S, D), jnp.float32)],   # head-concat buf
    )
    kernel = functools.partial(transformer_kernel, n_head=n_head, bt=bt,
                               compute_dtype=compute_dtype)
    return pl.pallas_call(
        kernel,
        out_shape=jax.ShapeDtypeStruct((B, S, D), x.dtype),
        grid_spec=grid_spec,
        compiler_params=pltpu.CompilerParams(
            dimension_semantics=("parallel", "arbitrary"),
            vmem_limit_bytes=64 * 1024 * 1024),
    )(x, params["pos"], params["mask"],
      params["ln1_w"], params["ln1_b"], params["w_qkv"], params["b_qkv"],
      params["w_out"], params["b_out"], params["ln2_w"], params["ln2_b"],
      params["w_fc"], params["b_fc"], params["w_pr"], params["b_pr"])


def final_project(x, eot_idx, lnf_w, lnf_b, proj, *, compute_dtype=jnp.bfloat16):
    B, S, D = x.shape
    E = proj.shape[1]
    grid_spec = pltpu.PrefetchScalarGridSpec(
        num_scalar_prefetch=1,
        grid=(1,),
        in_specs=[pl.BlockSpec((B, S, D), lambda i, eot: (0, 0, 0)),
                  pl.BlockSpec((1, D), lambda i, eot: (0, 0)),
                  pl.BlockSpec((1, D), lambda i, eot: (0, 0)),
                  pl.BlockSpec((D, E), lambda i, eot: (0, 0))],
        out_specs=pl.BlockSpec((B, E), lambda i, eot: (0, 0)),
    )
    kernel = functools.partial(final_kernel, batch=B, compute_dtype=compute_dtype)
    return pl.pallas_call(
        kernel,
        out_shape=jax.ShapeDtypeStruct((B, E), x.dtype),
        grid_spec=grid_spec,
        compiler_params=pltpu.CompilerParams(vmem_limit_bytes=64 * 1024 * 1024),
    )(eot_idx, x, lnf_w, lnf_b, proj)


def text_encoder_forward(x, tokenized_prompts, params, n_head,
                         compute_dtype=jnp.bfloat16):
    y = transformer_forward(x, params, n_head, compute_dtype=compute_dtype)
    # EOT index (argmax over token ids) is integer glue, matches torch argmax.
    eot_idx = jnp.argmax(tokenized_prompts, axis=-1).astype(jnp.int32)
    return final_project(y, eot_idx, params["lnf_w"], params["lnf_b"],
                         params["proj"], compute_dtype=compute_dtype)


# ------------------------ parameter setup (glue) ------------------------

def init_params(key, S, D, H, L, E):
    F = 4 * D
    keys = jax.random.split(key, 2 + L)
    pos = 0.01 * jax.random.normal(keys[0], (S, D), jnp.float32)
    proj = (D ** -0.5) * jax.random.normal(keys[1], (D, E), jnp.float32)
    layers = []
    for l in range(L):
        ks = jax.random.split(keys[2 + l], 8)
        layers.append(dict(
            w_in=0.02 * jax.random.normal(ks[0], (3 * D, D), jnp.float32),
            b_in=0.01 * jax.random.normal(ks[1], (3 * D,), jnp.float32),
            w_out=0.02 * jax.random.normal(ks[2], (D, D), jnp.float32),
            b_out=0.01 * jax.random.normal(ks[3], (D,), jnp.float32),
            ln1_w=jnp.ones((D,), jnp.float32), ln1_b=jnp.zeros((D,), jnp.float32),
            ln2_w=jnp.ones((D,), jnp.float32), ln2_b=jnp.zeros((D,), jnp.float32),
            w_fc=0.02 * jax.random.normal(ks[4], (F, D), jnp.float32),
            b_fc=0.01 * jax.random.normal(ks[5], (F,), jnp.float32),
            w_pr=0.02 * jax.random.normal(ks[6], (D, F), jnp.float32),
            b_pr=0.01 * jax.random.normal(ks[7], (D,), jnp.float32),
        ))
    mask = jnp.where(jnp.tril(jnp.ones((S, S), dtype=bool)), 0.0,
                     -jnp.inf).astype(jnp.float32)
    return dict(pos=pos, proj=proj, layers=layers,
                lnf_w=jnp.ones((D,), jnp.float32),
                lnf_b=jnp.zeros((D,), jnp.float32), mask=mask)


def to_kernel_params(raw, compute_dtype=jnp.bfloat16):
    """Stack per-layer weights on a leading L axis; matmul weights in bf16."""
    D = raw["pos"].shape[1]

    def stack(fn):
        return jnp.stack([fn(lyr) for lyr in raw["layers"]], axis=0)

    return dict(
        pos=raw["pos"],                                        # (S, D) f32
        mask=raw["mask"],                                      # (S, S) f32
        ln1_w=stack(lambda l: l["ln1_w"].reshape(1, D)),
        ln1_b=stack(lambda l: l["ln1_b"].reshape(1, D)),
        w_qkv=stack(lambda l: l["w_in"].T).astype(compute_dtype),   # (L, D, 3D)
        b_qkv=stack(lambda l: l["b_in"].reshape(1, -1)),
        w_out=stack(lambda l: l["w_out"].T).astype(compute_dtype),  # (L, D, D)
        b_out=stack(lambda l: l["b_out"].reshape(1, D)),
        ln2_w=stack(lambda l: l["ln2_w"].reshape(1, D)),
        ln2_b=stack(lambda l: l["ln2_b"].reshape(1, D)),
        w_fc=stack(lambda l: l["w_fc"].T).astype(compute_dtype),    # (L, D, F)
        b_fc=stack(lambda l: l["b_fc"].reshape(1, -1)),
        w_pr=stack(lambda l: l["w_pr"].T).astype(compute_dtype),    # (L, F, D)
        b_pr=stack(lambda l: l["b_pr"].reshape(1, -1)),
        lnf_w=raw["lnf_w"].reshape(1, D),
        lnf_b=raw["lnf_b"].reshape(1, D),
        proj=raw["proj"].astype(compute_dtype),                # (D, E)
    )


# ------------------------ pure-JAX reference ------------------------

def reference_forward(x, tok, raw, H):
    B, S, D = x.shape
    hd = D // H
    x = x + raw["pos"]
    for lyr in raw["layers"]:
        h = _layer_norm(x, lyr["ln1_w"], lyr["ln1_b"])
        qkv = h @ lyr["w_in"].T + lyr["b_in"]
        q, k, v = jnp.split(qkv, 3, axis=-1)
        heads = lambda t: t.reshape(B, S, H, hd).transpose(0, 2, 1, 3)
        q, k, v = heads(q), heads(k), heads(v)
        s = jnp.einsum("bhqd,bhkd->bhqk", q, k) / jnp.sqrt(float(hd)) + raw["mask"]
        p = jax.nn.softmax(s, axis=-1)
        o = jnp.einsum("bhqk,bhkd->bhqd", p, v).transpose(0, 2, 1, 3).reshape(B, S, D)
        x = x + (o @ lyr["w_out"].T + lyr["b_out"])
        h2 = _layer_norm(x, lyr["ln2_w"], lyr["ln2_b"])
        m = h2 @ lyr["w_fc"].T + lyr["b_fc"]
        m = m * jax.nn.sigmoid(1.702 * m)
        x = x + (m @ lyr["w_pr"].T + lyr["b_pr"])
    x = _layer_norm(x, raw["lnf_w"], raw["lnf_b"])
    eot = jnp.argmax(tok, axis=-1)
    return x[jnp.arange(B), eot] @ raw["proj"]


if __name__ == "__main__":
    B, S, D, H, L, E = 2, 8, 32, 4, 2, 16   # batch, seq, width, heads, layers, embed
    key = jax.random.PRNGKey(0)
    k_par, k_x, k_tok = jax.random.split(key, 3)

    raw = init_params(k_par, S, D, H, L, E)
    params = to_kernel_params(raw)

    x = 0.1 * jax.random.normal(k_x, (B, S, D), jnp.float32)
    tok = jax.random.randint(k_tok, (B, S), 1, 100).astype(jnp.int32)
    eot_pos = jnp.array([S - 2, 3], dtype=jnp.int32)
    tok = tok.at[jnp.arange(B), eot_pos].set(49407)   # unique EOT token per row

    out = text_encoder_forward(x, tok, params, H)
    out = jax.block_until_ready(out)

    ref = reference_forward(x, tok, raw, H)
    assert out.shape == (B, E)
    err = float(jnp.max(jnp.abs(out - ref)))
    assert err < 1e-1, f"max abs err {err}"   # bf16 matmuls vs f32 reference
    print("KERNEL_OK")
</pallas_src>

<mosaic_0001>
module attributes {stable_mosaic.version = 11 : i64} {
  func.func @transformer_kernel(%arg0: i32, %arg1: i32, %arg2: memref<1x8x32xf32, #tpu.memory_space<vmem>>, %arg3: memref<8x32xf32, #tpu.memory_space<vmem>>, %arg4: memref<8x8xf32, #tpu.memory_space<vmem>>, %arg5: memref<1x1x32xf32, #tpu.memory_space<vmem>>, %arg6: memref<1x1x32xf32, #tpu.memory_space<vmem>>, %arg7: memref<1x32x96xbf16, #tpu.memory_space<vmem>>, %arg8: memref<1x1x96xf32, #tpu.memory_space<vmem>>, %arg9: memref<1x32x32xbf16, #tpu.memory_space<vmem>>, %arg10: memref<1x1x32xf32, #tpu.memory_space<vmem>>, %arg11: memref<1x1x32xf32, #tpu.memory_space<vmem>>, %arg12: memref<1x1x32xf32, #tpu.memory_space<vmem>>, %arg13: memref<1x32x128xbf16, #tpu.memory_space<vmem>>, %arg14: memref<1x1x128xf32, #tpu.memory_space<vmem>>, %arg15: memref<1x128x32xbf16, #tpu.memory_space<vmem>>, %arg16: memref<1x1x32xf32, #tpu.memory_space<vmem>>, %arg17: memref<1x8x32xf32, #tpu.memory_space<vmem>>, %arg18: memref<8x32xf32, #tpu.memory_space<vmem>>) attributes {dimension_semantics = [#tpu.dimension_semantics<parallel>, #tpu.dimension_semantics<arbitrary>], iteration_bounds = array<i64: 2, 2>, scalar_prefetch = 0 : i64, scratch_operands = 1 : i64, tpu.core_type = #tpu.core_type<tc>, window_params = [{transform_indices = @transform_0, window_bounds = array<i64: 1, 8, 32>}, {pipeline_mode = #tpu.pipeline_mode<synchronous>, transform_indices = @transform_1, window_bounds = array<i64: 8, 32>}, {pipeline_mode = #tpu.pipeline_mode<synchronous>, transform_indices = @transform_2, window_bounds = array<i64: 8, 8>}, {transform_indices = @transform_3, window_bounds = array<i64: 1, 1, 32>}, {transform_indices = @transform_4, window_bounds = array<i64: 1, 1, 32>}, {transform_indices = @transform_5, window_bounds = array<i64: 1, 32, 96>}, {transform_indices = @transform_6, window_bounds = array<i64: 1, 1, 96>}, {transform_indices = @transform_7, window_bounds = array<i64: 1, 32, 32>}, {transform_indices = @transform_8, window_bounds = array<i64: 1, 1, 32>}, {transform_indices = @transform_9, window_bounds = array<i64: 1, 1, 32>}, {transform_indices = @transform_10, window_bounds = array<i64: 1, 1, 32>}, {transform_indices = @transform_11, window_bounds = array<i64: 1, 32, 128>}, {transform_indices = @transform_12, window_bounds = array<i64: 1, 1, 128>}, {transform_indices = @transform_13, window_bounds = array<i64: 1, 128, 32>}, {transform_indices = @transform_14, window_bounds = array<i64: 1, 1, 32>}, {transform_indices = @transform_15, window_bounds = array<i64: 1, 8, 32>}]} {
    %c0_i32 = arith.constant 0 : i32
    %0 = arith.cmpi eq, %arg1, %c0_i32 : i32
    %1 = arith.extui %0 : i1 to i32
    %c0_i32_0 = arith.constant 0 : i32
    %2 = arith.cmpi ne, %1, %c0_i32_0 : i32
    scf.if %2 {
      %c0_86 = arith.constant 0 : index
      %c0_87 = arith.constant 0 : index
      %c0_88 = arith.constant 0 : index
      %195 = vector.load %arg2[%c0_86, %c0_87, %c0_88] : memref<1x8x32xf32, #tpu.memory_space<vmem>>, vector<1x8x32xf32>
      %c0_89 = arith.constant 0 : index
      %c0_90 = arith.constant 0 : index
      %196 = vector.load %arg3[%c0_89, %c0_90] : memref<8x32xf32, #tpu.memory_space<vmem>>, vector<8x32xf32>
      %197 = vector.shape_cast %196 : vector<8x32xf32> to vector<1x8x32xf32>
      %198 = arith.addf %195, %197 : vector<1x8x32xf32>
      %c0_91 = arith.constant 0 : index
      %c0_92 = arith.constant 0 : index
      %c0_93 = arith.constant 0 : index
      %199 = vector.load %arg17[%c0_91, %c0_92, %c0_93] : memref<1x8x32xf32, #tpu.memory_space<vmem>>, vector<1x8x32xf32>
      tpu.vector_store %arg17[%c0_91, %c0_92, %c0_93], %198 {strides = array<i32>} : memref<1x8x32xf32, #tpu.memory_space<vmem>>, vector<1x8x32xf32>,
    } else {
    }
    %c0 = arith.constant 0 : index
    %c0_1 = arith.constant 0 : index
    %c0_2 = arith.constant 0 : index
    %3 = vector.load %arg17[%c0, %c0_1, %c0_2] : memref<1x8x32xf32, #tpu.memory_space<vmem>>, vector<1x8x32xf32>
    %4 = vector.shape_cast %3 : vector<1x8x32xf32> to vector<8x32xf32>
    %c0_3 = arith.constant 0 : index
    %c0_4 = arith.constant 0 : index
    %c0_5 = arith.constant 0 : index
    %5 = vector.load %arg5[%c0_3, %c0_4, %c0_5] : memref<1x1x32xf32, #tpu.memory_space<vmem>>, vector<1x1x32xf32>
    %6 = vector.shape_cast %5 : vector<1x1x32xf32> to vector<1x32xf32>
    %c0_6 = arith.constant 0 : index
    %c0_7 = arith.constant 0 : index
    %c0_8 = arith.constant 0 : index
    %7 = vector.load %arg6[%c0_6, %c0_7, %c0_8] : memref<1x1x32xf32, #tpu.memory_space<vmem>>, vector<1x1x32xf32>
    %8 = vector.shape_cast %7 : vector<1x1x32xf32> to vector<1x32xf32>
    %cst = arith.constant dense<0.000000e+00> : vector<8xf32>
    %9 = vector.multi_reduction <add>, %4, %cst [1] : vector<8x32xf32> to vector<8xf32>
    %10 = vector.shape_cast %9 : vector<8xf32> to vector<8x1xf32>
    %cst_9 = arith.constant 3.200000e+01 : f32
    %11 = vector.broadcast %cst_9 : f32 to vector<8x1xf32>
    %12 = arith.divf %10, %11 : vector<8x1xf32>
    %13 = vector.broadcast %12 : vector<8x1xf32> to vector<8x32xf32>
    %14 = arith.subf %4, %13 : vector<8x32xf32>
    %15 = arith.mulf %14, %14 : vector<8x32xf32>
    %cst_10 = arith.constant dense<0.000000e+00> : vector<8xf32>
    %16 = vector.multi_reduction <add>, %15, %cst_10 [1] : vector<8x32xf32> to vector<8xf32>
    %17 = vector.shape_cast %16 : vector<8xf32> to vector<8x1xf32>
    %cst_11 = arith.constant 3.200000e+01 : f32
    %18 = vector.broadcast %cst_11 : f32 to vector<8x1xf32>
    %19 = arith.divf %17, %18 : vector<8x1xf32>
    %20 = vector.broadcast %12 : vector<8x1xf32> to vector<8x32xf32>
    %21 = arith.subf %4, %20 : vector<8x32xf32>
    %cst_12 = arith.constant 9.99999974E-6 : f32
    %22 = vector.broadcast %cst_12 : f32 to vector<8x1xf32>
    %23 = arith.addf %19, %22 : vector<8x1xf32>
    %24 = math.rsqrt %23 : vector<8x1xf32>
    %25 = vector.broadcast %24 : vector<8x1xf32> to vector<8x32xf32>
    %26 = arith.mulf %21, %25 : vector<8x32xf32>
    %27 = vector.broadcast %6 : vector<1x32xf32> to vector<8x32xf32>
    %28 = arith.mulf %26, %27 : vector<8x32xf32>
    %29 = vector.broadcast %8 : vector<1x32xf32> to vector<8x32xf32>
    %30 = arith.addf %28, %29 : vector<8x32xf32>
    %31 = arith.truncf %30 : vector<8x32xf32> to vector<8x32xbf16>
    %c0_13 = arith.constant 0 : index
    %c0_14 = arith.constant 0 : index
    %c0_15 = arith.constant 0 : index
    %32 = vector.load %arg7[%c0_13, %c0_14, %c0_15] : memref<1x32x96xbf16, #tpu.memory_space<vmem>>, vector<1x32x96xbf16>
    %33 = vector.shape_cast %32 : vector<1x32x96xbf16> to vector<32x96xbf16>
    %cst_16 = arith.constant dense<0.000000e+00> : vector<8x96xf32>
    %34 = tpu.matmul %31, %33, %cst_16 {dimension_numbers = #tpu.dot_dimension_numbers<[1], [0], [0], [1], [0, 0, 1, 1], [], []>} : vector<8x32xbf16>, vector<32x96xbf16>, vector<8x96xf32> -> vector<8x96xf32>
    %c0_17 = arith.constant 0 : index
    %c0_18 = arith.constant 0 : index
    %c0_19 = arith.constant 0 : index
    %35 = vector.load %arg8[%c0_17, %c0_18, %c0_19] : memref<1x1x96xf32, #tpu.memory_space<vmem>>, vector<1x1x96xf32>
    %36 = vector.shape_cast %35 : vector<1x1x96xf32> to vector<1x96xf32>
    %37 = vector.broadcast %36 : vector<1x96xf32> to vector<8x96xf32>
    %38 = arith.addf %34, %37 : vector<8x96xf32>
    %c0_20 = arith.constant 0 : index
    %c0_21 = arith.constant 0 : index
    %39 = vector.load %arg4[%c0_20, %c0_21] : memref<8x8xf32, #tpu.memory_space<vmem>>, vector<8x8xf32>
    %40 = vector.extract_strided_slice %38 {offsets = [0, 0], sizes = [8, 8], strides = [1, 1]} : vector<8x96xf32> to vector<8x8xf32>
    %41 = arith.truncf %40 : vector<8x8xf32> to vector<8x8xbf16>
    %42 = vector.extract_strided_slice %38 {offsets = [0, 32], sizes = [8, 8], strides = [1, 1]} : vector<8x96xf32> to vector<8x8xf32>
    %43 = arith.truncf %42 : vector<8x8xf32> to vector<8x8xbf16>
    %44 = vector.extract_strided_slice %38 {offsets = [0, 64], sizes = [8, 8], strides = [1, 1]} : vector<8x96xf32> to vector<8x8xf32>
    %45 = arith.truncf %44 : vector<8x8xf32> to vector<8x8xbf16>
    %cst_22 = arith.constant dense<0.000000e+00> : vector<8x8xf32>
    %46 = tpu.matmul %41, %43, %cst_22 {dimension_numbers = #tpu.dot_dimension_numbers<[1], [1], [0], [0], [0, 0, 1, 0], [], []>} : vector<8x8xbf16>, vector<8x8xbf16>, vector<8x8xf32> -> vector<8x8xf32>
    %cst_23 = arith.constant 0.353553385 : f32
    %47 = vector.broadcast %cst_23 : f32 to vector<8x8xf32>
    %48 = arith.mulf %46, %47 : vector<8x8xf32>
    %49 = arith.addf %48, %39 : vector<8x8xf32>
    %cst_24 = arith.constant dense<0xFF800000> : vector<8xf32>
    %50 = vector.multi_reduction <maximumf>, %49, %cst_24 [1] : vector<8x8xf32> to vector<8xf32>
    %51 = vector.shape_cast %50 : vector<8xf32> to vector<8x1xf32>
    %52 = vector.broadcast %51 : vector<8x1xf32> to vector<8x8xf32>
    %53 = arith.subf %49, %52 : vector<8x8xf32>
    %54 = math.exp %53 : vector<8x8xf32>
    %cst_25 = arith.constant dense<0.000000e+00> : vector<8xf32>
    %55 = vector.multi_reduction <add>, %54, %cst_25 [1] : vector<8x8xf32> to vector<8xf32>
    %56 = vector.shape_cast %55 : vector<8xf32> to vector<8x1xf32>
    %57 = tpu.reciprocal %56 {approx = true} : vector<8x1xf32> -> vector<8x1xf32>
    %58 = vector.broadcast %57 : vector<8x1xf32> to vector<8x8xf32>
    %59 = arith.mulf %54, %58 : vector<8x8xf32>
    %60 = arith.truncf %59 : vector<8x8xf32> to vector<8x8xbf16>
    %cst_26 = arith.constant dense<0.000000e+00> : vector<8x8xf32>
    %61 = tpu.matmul %60, %45, %cst_26 {dimension_numbers = #tpu.dot_dimension_numbers<[1], [0], [0], [1], [0, 0, 1, 1], [], []>} : vector<8x8xbf16>, vector<8x8xbf16>, vector<8x8xf32> -> vector<8x8xf32>
    %c0_27 = arith.constant 0 : index
    %c0_28 = arith.constant 0 : index
    %62 = vector.load %arg18[%c0_27, %c0_28] : memref<8x32xf32, #tpu.memory_space<vmem>>, vector<8x8xf32>
    tpu.vector_store %arg18[%c0_27, %c0_28], %61 {strides = array<i32>} : memref<8x32xf32, #tpu.memory_space<vmem>>, vector<8x8xf32>,
    %63 = vector.extract_strided_slice %38 {offsets = [0, 8], sizes = [8, 8], strides = [1, 1]} : vector<8x96xf32> to vector<8x8xf32>
    %64 = arith.truncf %63 : vector<8x8xf32> to vector<8x8xbf16>
    %65 = vector.extract_strided_slice %38 {offsets = [0, 40], sizes = [8, 8], strides = [1, 1]} : vector<8x96xf32> to vector<8x8xf32>
    %66 = arith.truncf %65 : vector<8x8xf32> to vector<8x8xbf16>
    %67 = vector.extract_strided_slice %38 {offsets = [0, 72], sizes = [8, 8], strides = [1, 1]} : vector<8x96xf32> to vector<8x8xf32>
    %68 = arith.truncf %67 : vector<8x8xf32> to vector<8x8xbf16>
    %cst_29 = arith.constant dense<0.000000e+00> : vector<8x8xf32>
    %69 = tpu.matmul %64, %66, %cst_29 {dimension_numbers = #tpu.dot_dimension_numbers<[1], [1], [0], [0], [0, 0, 1, 0], [], []>} : vector<8x8xbf16>, vector<8x8xbf16>, vector<8x8xf32> -> vector<8x8xf32>
    %cst_30 = arith.constant 0.353553385 : f32
    %70 = vector.broadcast %cst_30 : f32 to vector<8x8xf32>
    %71 = arith.mulf %69, %70 : vector<8x8xf32>
    %72 = arith.addf %71, %39 : vector<8x8xf32>
    %cst_31 = arith.constant dense<0xFF800000> : vector<8xf32>
    %73 = vector.multi_reduction <maximumf>, %72, %cst_31 [1] : vector<8x8xf32> to vector<8xf32>
    %74 = vector.shape_cast %73 : vector<8xf32> to vector<8x1xf32>
    %75 = vector.broadcast %74 : vector<8x1xf32> to vector<8x8xf32>
    %76 = arith.subf %72, %75 : vector<8x8xf32>
    %77 = math.exp %76 : vector<8x8xf32>
    %cst_32 = arith.constant dense<0.000000e+00> : vector<8xf32>
    %78 = vector.multi_reduction <add>, %77, %cst_32 [1] : vector<8x8xf32> to vector<8xf32>
    %79 = vector.shape_cast %78 : vector<8xf32> to vector<8x1xf32>
    %80 = tpu.reciprocal %79 {approx = true} : vector<8x1xf32> -> vector<8x1xf32>
    %81 = vector.broadcast %80 : vector<8x1xf32> to vector<8x8xf32>
    %82 = arith.mulf %77, %81 : vector<8x8xf32>
    %83 = arith.truncf %82 : vector<8x8xf32> to vector<8x8xbf16>
    %cst_33 = arith.constant dense<0.000000e+00> : vector<8x8xf32>
    %84 = tpu.matmul %83, %68, %cst_33 {dimension_numbers = #tpu.dot_dimension_numbers<[1], [0], [0], [1], [0, 0, 1, 1], [], []>} : vector<8x8xbf16>, vector<8x8xbf16>, vector<8x8xf32> -> vector<8x8xf32>
    %c0_34 = arith.constant 0 : index
    %c8 = arith.constant 8 : index
    %85 = vector.load %arg18[%c0_34, %c8] : memref<8x32xf32, #tpu.memory_space<vmem>>, vector<8x8xf32>
    tpu.vector_store %arg18[%c0_34, %c8], %84 {strides = array<i32>} : memref<8x32xf32, #tpu.memory_space<vmem>>, vector<8x8xf32>,
    %86 = vector.extract_strided_slice %38 {offsets = [0, 16], sizes = [8, 8], strides = [1, 1]} : vector<8x96xf32> to vector<8x8xf32>
    %87 = arith.truncf %86 : vector<8x8xf32> to vector<8x8xbf16>
    %88 = vector.extract_strided_slice %38 {offsets = [0, 48], sizes = [8, 8], strides = [1, 1]} : vector<8x96xf32> to vector<8x8xf32>
    %89 = arith.truncf %88 : vector<8x8xf32> to vector<8x8xbf16>
    %90 = vector.extract_strided_slice %38 {offsets = [0, 80], sizes = [8, 8], strides = [1, 1]} : vector<8x96xf32> to vector<8x8xf32>
    %91 = arith.truncf %90 : vector<8x8xf32> to vector<8x8xbf16>
    %cst_35 = arith.constant dense<0.000000e+00> : vector<8x8xf32>
    %92 = tpu.matmul %87, %89, %cst_35 {dimension_numbers = #tpu.dot_dimension_numbers<[1], [1], [0], [0], [0, 0, 1, 0], [], []>} : vector<8x8xbf16>, vector<8x8xbf16>, vector<8x8xf32> -> vector<8x8xf32>
    %cst_36 = arith.constant 0.353553385 : f32
    %93 = vector.broadcast %cst_36 : f32 to vector<8x8xf32>
    %94 = arith.mulf %92, %93 : vector<8x8xf32>
    %95 = arith.addf %94, %39 : vector<8x8xf32>
    %cst_37 = arith.constant dense<0xFF800000> : vector<8xf32>
    %96 = vector.multi_reduction <maximumf>, %95, %cst_37 [1] : vector<8x8xf32> to vector<8xf32>
    %97 = vector.shape_cast %96 : vector<8xf32> to vector<8x1xf32>
    %98 = vector.broadcast %97 : vector<8x1xf32> to vector<8x8xf32>
    %99 = arith.subf %95, %98 : vector<8x8xf32>
    %100 = math.exp %99 : vector<8x8xf32>
    %cst_38 = arith.constant dense<0.000000e+00> : vector<8xf32>
    %101 = vector.multi_reduction <add>, %100, %cst_38 [1] : vector<8x8xf32> to vector<8xf32>
    %102 = vector.shape_cast %101 : vector<8xf32> to vector<8x1xf32>
    %103 = tpu.reciprocal %102 {approx = true} : vector<8x1xf32> -> vector<8x1xf32>
    %104 = vector.broadcast %103 : vector<8x1xf32> to vector<8x8xf32>
    %105 = arith.mulf %100, %104 : vector<8x8xf32>
    %106 = arith.truncf %105 : vector<8x8xf32> to vector<8x8xbf16>
    %cst_39 = arith.constant dense<0.000000e+00> : vector<8x8xf32>
    %107 = tpu.matmul %106, %91, %cst_39 {dimension_numbers = #tpu.dot_dimension_numbers<[1], [0], [0], [1], [0, 0, 1, 1], [], []>} : vector<8x8xbf16>, vector<8x8xbf16>, vector<8x8xf32> -> vector<8x8xf32>
    %c0_40 = arith.constant 0 : index
    %c16 = arith.constant 16 : index
    %108 = vector.load %arg18[%c0_40, %c16] : memref<8x32xf32, #tpu.memory_space<vmem>>, vector<8x8xf32>
    tpu.vector_store %arg18[%c0_40, %c16], %107 {strides = array<i32>} : memref<8x32xf32, #tpu.memory_space<vmem>>, vector<8x8xf32>,
    %109 = vector.extract_strided_slice %38 {offsets = [0, 24], sizes = [8, 8], strides = [1, 1]} : vector<8x96xf32> to vector<8x8xf32>
    %110 = arith.truncf %109 : vector<8x8xf32> to vector<8x8xbf16>
    %111 = vector.extract_strided_slice %38 {offsets = [0, 56], sizes = [8, 8], strides = [1, 1]} : vector<8x96xf32> to vector<8x8xf32>
    %112 = arith.truncf %111 : vector<8x8xf32> to vector<8x8xbf16>
    %113 = vector.extract_strided_slice %38 {offsets = [0, 88], sizes = [8, 8], strides = [1, 1]} : vector<8x96xf32> to vector<8x8xf32>
    %114 = arith.truncf %113 : vector<8x8xf32> to vector<8x8xbf16>
    %cst_41 = arith.constant dense<0.000000e+00> : vector<8x8xf32>
    %115 = tpu.matmul %110, %112, %cst_41 {dimension_numbers = #tpu.dot_dimension_numbers<[1], [1], [0], [0], [0, 0, 1, 0], [], []>} : vector<8x8xbf16>, vector<8x8xbf16>, vector<8x8xf32> -> vector<8x8xf32>
    %cst_42 = arith.constant 0.353553385 : f32
    %116 = vector.broadcast %cst_42 : f32 to vector<8x8xf32>
    %117 = arith.mulf %115, %116 : vector<8x8xf32>
    %118 = arith.addf %117, %39 : vector<8x8xf32>
    %cst_43 = arith.constant dense<0xFF800000> : vector<8xf32>
    %119 = vector.multi_reduction <maximumf>, %118, %cst_43 [1] : vector<8x8xf32> to vector<8xf32>
    %120 = vector.shape_cast %119 : vector<8xf32> to vector<8x1xf32>
    %121 = vector.broadcast %120 : vector<8x1xf32> to vector<8x8xf32>
    %122 = arith.subf %118, %121 : vector<8x8xf32>
    %123 = math.exp %122 : vector<8x8xf32>
    %cst_44 = arith.constant dense<0.000000e+00> : vector<8xf32>
    %124 = vector.multi_reduction <add>, %123, %cst_44 [1] : vector<8x8xf32> to vector<8xf32>
    %125 = vector.shape_cast %124 : vector<8xf32> to vector<8x1xf32>
    %126 = tpu.reciprocal %125 {approx = true} : vector<8x1xf32> -> vector<8x1xf32>
    %127 = vector.broadcast %126 : vector<8x1xf32> to vector<8x8xf32>
    %128 = arith.mulf %123, %127 : vector<8x8xf32>
    %129 = arith.truncf %128 : vector<8x8xf32> to vector<8x8xbf16>
    %cst_45 = arith.constant dense<0.000000e+00> : vector<8x8xf32>
    %130 = tpu.matmul %129, %114, %cst_45 {dimension_numbers = #tpu.dot_dimension_numbers<[1], [0], [0], [1], [0, 0, 1, 1], [], []>} : vector<8x8xbf16>, vector<8x8xbf16>, vector<8x8xf32> -> vector<8x8xf32>
    %c0_46 = arith.constant 0 : index
    %c24 = arith.constant 24 : index
    %131 = vector.load %arg18[%c0_46, %c24] : memref<8x32xf32, #tpu.memory_space<vmem>>, vector<8x8xf32>
    tpu.vector_store %arg18[%c0_46, %c24], %130 {strides = array<i32>} : memref<8x32xf32, #tpu.memory_space<vmem>>, vector<8x8xf32>,
    %c0_47 = arith.constant 0 : index
    %c0_48 = arith.constant 0 : index
    %132 = vector.load %arg18[%c0_47, %c0_48] : memref<8x32xf32, #tpu.memory_space<vmem>>, vector<8x32xf32>
    %133 = arith.truncf %132 : vector<8x32xf32> to vector<8x32xbf16>
    %c0_49 = arith.constant 0 : index
    %c0_50 = arith.constant 0 : index
    %c0_51 = arith.constant 0 : index
    %134 = vector.load %arg9[%c0_49, %c0_50, %c0_51] : memref<1x32x32xbf16, #tpu.memory_space<vmem>>, vector<1x32x32xbf16>
    %135 = vector.shape_cast %134 : vector<1x32x32xbf16> to vector<32x32xbf16>
    %cst_52 = arith.constant dense<0.000000e+00> : vector<8x32xf32>
    %136 = tpu.matmul %133, %135, %cst_52 {dimension_numbers = #tpu.dot_dimension_numbers<[1], [0], [0], [1], [0, 0, 1, 1], [], []>} : vector<8x32xbf16>, vector<32x32xbf16>, vector<8x32xf32> -> vector<8x32xf32>
    %c0_53 = arith.constant 0 : index
    %c0_54 = arith.constant 0 : index
    %c0_55 = arith.constant 0 : index
    %137 = vector.load %arg10[%c0_53, %c0_54, %c0_55] : memref<1x1x32xf32, #tpu.memory_space<vmem>>, vector<1x1x32xf32>
    %138 = vector.shape_cast %137 : vector<1x1x32xf32> to vector<1x32xf32>
    %139 = vector.broadcast %138 : vector<1x32xf32> to vector<8x32xf32>
    %140 = arith.addf %136, %139 : vector<8x32xf32>
    %141 = arith.addf %4, %140 : vector<8x32xf32>
    %c0_56 = arith.constant 0 : index
    %c0_57 = arith.constant 0 : index
    %c0_58 = arith.constant 0 : index
    %142 = vector.load %arg11[%c0_56, %c0_57, %c0_58] : memref<1x1x32xf32, #tpu.memory_space<vmem>>, vector<1x1x32xf32>
    %143 = vector.shape_cast %142 : vector<1x1x32xf32> to vector<1x32xf32>
    %c0_59 = arith.constant 0 : index
    %c0_60 = arith.constant 0 : index
    %c0_61 = arith.constant 0 : index
    %144 = vector.load %arg12[%c0_59, %c0_60, %c0_61] : memref<1x1x32xf32, #tpu.memory_space<vmem>>, vector<1x1x32xf32>
    %145 = vector.shape_cast %144 : vector<1x1x32xf32> to vector<1x32xf32>
    %cst_62 = arith.constant dense<0.000000e+00> : vector<8xf32>
    %146 = vector.multi_reduction <add>, %141, %cst_62 [1] : vector<8x32xf32> to vector<8xf32>
    %147 = vector.shape_cast %146 : vector<8xf32> to vector<8x1xf32>
    %cst_63 = arith.constant 3.200000e+01 : f32
    %148 = vector.broadcast %cst_63 : f32 to vector<8x1xf32>
    %149 = arith.divf %147, %148 : vector<8x1xf32>
    %150 = vector.broadcast %149 : vector<8x1xf32> to vector<8x32xf32>
    %151 = arith.subf %141, %150 : vector<8x32xf32>
    %152 = arith.mulf %151, %151 : vector<8x32xf32>
    %cst_64 = arith.constant dense<0.000000e+00> : vector<8xf32>
    %153 = vector.multi_reduction <add>, %152, %cst_64 [1] : vector<8x32xf32> to vector<8xf32>
    %154 = vector.shape_cast %153 : vector<8xf32> to vector<8x1xf32>
    %cst_65 = arith.constant 3.200000e+01 : f32
    %155 = vector.broadcast %cst_65 : f32 to vector<8x1xf32>
    %156 = arith.divf %154, %155 : vector<8x1xf32>
    %157 = vector.broadcast %149 : vector<8x1xf32> to vector<8x32xf32>
    %158 = arith.subf %141, %157 : vector<8x32xf32>
    %cst_66 = arith.constant 9.99999974E-6 : f32
    %159 = vector.broadcast %cst_66 : f32 to vector<8x1xf32>
    %160 = arith.addf %156, %159 : vector<8x1xf32>
    %161 = math.rsqrt %160 : vector<8x1xf32>
    %162 = vector.broadcast %161 : vector<8x1xf32> to vector<8x32xf32>
    %163 = arith.mulf %158, %162 : vector<8x32xf32>
    %164 = vector.broadcast %143 : vector<1x32xf32> to vector<8x32xf32>
    %165 = arith.mulf %163, %164 : vector<8x32xf32>
    %166 = vector.broadcast %145 : vector<1x32xf32> to vector<8x32xf32>
    %167 = arith.addf %165, %166 : vector<8x32xf32>
    %168 = arith.truncf %167 : vector<8x32xf32> to vector<8x32xbf16>
    %c0_67 = arith.constant 0 : index
    %c0_68 = arith.constant 0 : index
    %c0_69 = arith.constant 0 : index
    %169 = vector.load %arg13[%c0_67, %c0_68, %c0_69] : memref<1x32x128xbf16, #tpu.memory_space<vmem>>, vector<1x32x128xbf16>
    %170 = vector.shape_cast %169 : vector<1x32x128xbf16> to vector<32x128xbf16>
    %cst_70 = arith.constant dense<0.000000e+00> : vector<8x128xf32>
    %171 = tpu.matmul %168, %170, %cst_70 {dimension_numbers = #tpu.dot_dimension_numbers<[1], [0], [0], [1], [0, 0, 1, 1], [], []>} : vector<8x32xbf16>, vector<32x128xbf16>, vector<8x128xf32> -> vector<8x128xf32>
    %c0_71 = arith.constant 0 : index
    %c0_72 = arith.constant 0 : index
    %c0_73 = arith.constant 0 : index
    %172 = vector.load %arg14[%c0_71, %c0_72, %c0_73] : memref<1x1x128xf32, #tpu.memory_space<vmem>>, vector<1x1x128xf32>
    %173 = vector.shape_cast %172 : vector<1x1x128xf32> to vector<1x128xf32>
    %174 = vector.broadcast %173 : vector<1x128xf32> to vector<8x128xf32>
    %175 = arith.addf %171, %174 : vector<8x128xf32>
    %cst_74 = arith.constant 1.702000e+00 : f32
    %176 = vector.broadcast %cst_74 : f32 to vector<8x128xf32>
    %177 = arith.mulf %176, %175 : vector<8x128xf32>
    %178 = arith.negf %177 : vector<8x128xf32>
    %179 = math.exp %178 : vector<8x128xf32>
    %cst_75 = arith.constant 1.000000e+00 : f32
    %180 = vector.broadcast %cst_75 : f32 to vector<8x128xf32>
    %181 = arith.addf %180, %179 : vector<8x128xf32>
    %182 = arith.divf %180, %181 : vector<8x128xf32>
    %183 = arith.mulf %175, %182 : vector<8x128xf32>
    %184 = arith.truncf %183 : vector<8x128xf32> to vector<8x128xbf16>
    %c0_76 = arith.constant 0 : index
    %c0_77 = arith.constant 0 : index
    %c0_78 = arith.constant 0 : index
    %185 = vector.load %arg15[%c0_76, %c0_77, %c0_78] : memref<1x128x32xbf16, #tpu.memory_space<vmem>>, vector<1x128x32xbf16>
    %186 = vector.shape_cast %185 : vector<1x128x32xbf16> to vector<128x32xbf16>
    %cst_79 = arith.constant dense<0.000000e+00> : vector<8x32xf32>
    %187 = tpu.matmul %184, %186, %cst_79 {dimension_numbers = #tpu.dot_dimension_numbers<[1], [0], [0], [1], [0, 0, 1, 1], [], []>} : vector<8x128xbf16>, vector<128x32xbf16>, vector<8x32xf32> -> vector<8x32xf32>
    %c0_80 = arith.constant 0 : index
    %c0_81 = arith.constant 0 : index
    %c0_82 = arith.constant 0 : index
    %188 = vector.load %arg16[%c0_80, %c0_81, %c0_82] : memref<1x1x32xf32, #tpu.memory_space<vmem>>, vector<1x1x32xf32>
    %189 = vector.shape_cast %188 : vector<1x1x32xf32> to vector<1x32xf32>
    %190 = vector.broadcast %189 : vector<1x32xf32> to vector<8x32xf32>
    %191 = arith.addf %187, %190 : vector<8x32xf32>
    %192 = arith.addf %141, %191 : vector<8x32xf32>
    %193 = vector.shape_cast %192 : vector<8x32xf32> to vector<1x8x32xf32>
    %c0_83 = arith.constant 0 : index
    %c0_84 = arith.constant 0 : index
    %c0_85 = arith.constant 0 : index
    %194 = vector.load %arg17[%c0_83, %c0_84, %c0_85] : memref<1x8x32xf32, #tpu.memory_space<vmem>>, vector<1x8x32xf32>
    tpu.vector_store %arg17[%c0_83, %c0_84, %c0_85], %193 {strides = array<i32>} : memref<1x8x32xf32, #tpu.memory_space<vmem>>, vector<1x8x32xf32>,
    return
  }
  func.func @transform_0(%arg0: i32, %arg1: i32) -> (i32, i32, i32) {
    %c0_i32 = arith.constant 0 : i32
    %c0_i32_0 = arith.constant 0 : i32
    %c0_i32_1 = arith.constant 0 : i32
    return %arg0, %c0_i32, %c0_i32_0 : i32, i32, i32
  }
  func.func @transform_1(%arg0: i32, %arg1: i32) -> (i32, i32) {
    %c0_i32 = arith.constant 0 : i32
    %c0_i32_0 = arith.constant 0 : i32
    %c0_i32_1 = arith.constant 0 : i32
    return %c0_i32, %c0_i32_0 : i32, i32
  }
  func.func @transform_2(%arg0: i32, %arg1: i32) -> (i32, i32) {
    %c0_i32 = arith.constant 0 : i32
    %c0_i32_0 = arith.constant 0 : i32
    %c0_i32_1 = arith.constant 0 : i32
    return %c0_i32, %c0_i32_0 : i32, i32
  }
  func.func @transform_3(%arg0: i32, %arg1: i32) -> (i32, i32, i32) {
    %c0_i32 = arith.constant 0 : i32
    %c0_i32_0 = arith.constant 0 : i32
    %c0_i32_1 = arith.constant 0 : i32
    return %arg1, %c0_i32, %c0_i32_0 : i32, i32, i32
  }
  func.func @transform_4(%arg0: i32, %arg1: i32) -> (i32, i32, i32) {
    %c0_i32 = arith.constant 0 : i32
    %c0_i32_0 = arith.constant 0 : i32
    %c0_i32_1 = arith.constant 0 : i32
    return %arg1, %c0_i32, %c0_i32_0 : i32, i32, i32
  }
  func.func @transform_5(%arg0: i32, %arg1: i32) -> (i32, i32, i32) {
    %c0_i32 = arith.constant 0 : i32
    %c0_i32_0 = arith.constant 0 : i32
    %c0_i32_1 = arith.constant 0 : i32
    return %arg1, %c0_i32, %c0_i32_0 : i32, i32, i32
  }
  func.func @transform_6(%arg0: i32, %arg1: i32) -> (i32, i32, i32) {
    %c0_i32 = arith.constant 0 : i32
    %c0_i32_0 = arith.constant 0 : i32
    %c0_i32_1 = arith.constant 0 : i32
    return %arg1, %c0_i32, %c0_i32_0 : i32, i32, i32
  }
  func.func @transform_7(%arg0: i32, %arg1: i32) -> (i32, i32, i32) {
    %c0_i32 = arith.constant 0 : i32
    %c0_i32_0 = arith.constant 0 : i32
    %c0_i32_1 = arith.constant 0 : i32
    return %arg1, %c0_i32, %c0_i32_0 : i32, i32, i32
  }
  func.func @transform_8(%arg0: i32, %arg1: i32) -> (i32, i32, i32) {
    %c0_i32 = arith.constant 0 : i32
    %c0_i32_0 = arith.constant 0 : i32
    %c0_i32_1 = arith.constant 0 : i32
    return %arg1, %c0_i32, %c0_i32_0 : i32, i32, i32
  }
  func.func @transform_9(%arg0: i32, %arg1: i32) -> (i32, i32, i32) {
    %c0_i32 = arith.constant 0 : i32
    %c0_i32_0 = arith.constant 0 : i32
    %c0_i32_1 = arith.constant 0 : i32
    return %arg1, %c0_i32, %c0_i32_0 : i32, i32, i32
  }
  func.func @transform_10(%arg0: i32, %arg1: i32) -> (i32, i32, i32) {
    %c0_i32 = arith.constant 0 : i32
    %c0_i32_0 = arith.constant 0 : i32
    %c0_i32_1 = arith.constant 0 : i32
    return %arg1, %c0_i32, %c0_i32_0 : i32, i32, i32
  }
  func.func @transform_11(%arg0: i32, %arg1: i32) -> (i32, i32, i32) {
    %c0_i32 = arith.constant 0 : i32
    %c0_i32_0 = arith.constant 0 : i32
    %c0_i32_1 = arith.constant 0 : i32
    return %arg1, %c0_i32, %c0_i32_0 : i32, i32, i32
  }
  func.func @transform_12(%arg0: i32, %arg1: i32) -> (i32, i32, i32) {
    %c0_i32 = arith.constant 0 : i32
    %c0_i32_0 = arith.constant 0 : i32
    %c0_i32_1 = arith.constant 0 : i32
    return %arg1, %c0_i32, %c0_i32_0 : i32, i32, i32
  }
  func.func @transform_13(%arg0: i32, %arg1: i32) -> (i32, i32, i32) {
    %c0_i32 = arith.constant 0 : i32
    %c0_i32_0 = arith.constant 0 : i32
    %c0_i32_1 = arith.constant 0 : i32
    return %arg1, %c0_i32, %c0_i32_0 : i32, i32, i32
  }
  func.func @transform_14(%arg0: i32, %arg1: i32) -> (i32, i32, i32) {
    %c0_i32 = arith.constant 0 : i32
    %c0_i32_0 = arith.constant 0 : i32
    %c0_i32_1 = arith.constant 0 : i32
    return %arg1, %c0_i32, %c0_i32_0 : i32, i32, i32
  }
  func.func @transform_15(%arg0: i32, %arg1: i32) -> (i32, i32, i32) {
    %c0_i32 = arith.constant 0 : i32
    %c0_i32_0 = arith.constant 0 : i32
    %c0_i32_1 = arith.constant 0 : i32
    return %arg0, %c0_i32, %c0_i32_0 : i32, i32, i32
  }
}

</mosaic_0001>

<bundles_post_ra>
// kernel: tpu_custom_call.1
= control target key start
LH: loop header
LB: loop body
LE: loop exit
PB: predicated region body
PF: predicated region fallthrough
CT: control target
= control target key end

     0   :  { %s2181_s0 = inlined_call_operand.vmem [shape: f32[2,8,32], index: 0, kind: input, shape index: {}]   ;;  %s2182_s1 = inlined_call_operand.vmem [shape: f32[8,32], index: 1, kind: input, shape index: {}]   ;;  %s2183_s2 = inlined_call_operand.vmem [shape: f32[8,8], index: 2, kind: input, shape index: {}]   ;;  %s2184_s3 = inlined_call_operand.vmem [shape: f32[2,1,32], index: 3, kind: input, shape index: {}]   ;;  %s2185_s4 = inlined_call_operand.vmem [shape: f32[2,1,32], index: 4, kind: input, shape index: {}]   ;;  %s2186_s5 = inlined_call_operand.vmem [shape: bf16[2,32,96], index: 5, kind: input, shape index: {}]   ;;  %s2187_s6 = inlined_call_operand.vmem [shape: f32[2,1,96], index: 6, kind: input, shape index: {}]   ;;  %s2188_s7 = inlined_call_operand.vmem [shape: bf16[2,32,32], index: 7, kind: input, shape index: {}]   ;;  %s2189_s8 = inlined_call_operand.vmem [shape: f32[2,1,32], index: 8, kind: input, shape index: {}]   ;;  %s2190_s9 = inlined_call_operand.vmem [shape: f32[2,1,32], index: 9, kind: input, shape index: {}]   ;;  %s2191_s10 = inlined_call_operand.vmem [shape: f32[2,1,32], index: 10, kind: input, shape index: {}]   ;;  %s2192_s11 = inlined_call_operand.vmem [shape: bf16[2,32,128], index: 11, kind: input, shape index: {}]   ;;  %s2193_s12 = inlined_call_operand.vmem [shape: f32[2,1,128], index: 12, kind: input, shape index: {}]   ;;  %s2194_s13 = inlined_call_operand.vmem [shape: bf16[2,128,32], index: 13, kind: input, shape index: {}]   ;;  %s2195_s14 = inlined_call_operand.vmem [shape: f32[2,1,32], index: 14, kind: input, shape index: {}]   ;;  %s2196_s15 = inlined_call_operand.hbm [shape: f32[2,8,32], index: 15, kind: output, shape index: {}]  }
   0x1   :  { %2212 = sst [smem:[#allocation19_spill]] %s2181_s0 }
   0x2   :  { %2213 = sst [smem:[#allocation20_spill]] %s2182_s1 }
   0x3   :  { %2214 = sst [smem:[#allocation21_spill]] %s2183_s2 }
   0x4   :  { %2215 = sst [smem:[#allocation22_spill]] %s2186_s5 }
   0x5   :  { %2216 = sst [smem:[#allocation23_spill]] %s2188_s7 }
   0x6   :  { %2217 = sst [smem:[#allocation24_spill]] %s2190_s9 }
   0x7   :  { %2218 = sst [smem:[#allocation25_spill]] %s2194_s13 }
   0x8   :  { %2219 = sst [smem:[#allocation26_spill]] %s2196_s15 }
   0x9   :  { %20 = vsyncpa [#allocation4], 0 }
   0xa   :  { %22 = vsyncpa [#allocation4 + $0x1], 0  ;;  %s1872_s18 = smov 0   ;;  %s1874_s19 = smov 0  }
   0xb   :  { %s1876_s20 = smov 0   ;;  %s1878_s21 = smov 0  }
   0xc   :  { %s1880_s22 = smov 0   ;;  %s1882_s23 = smov 0  }
   0xd   :  { %s1884_s24 = smov 0   ;;  %s1886_s25 = smov 0  }
   0xe LB: > { %2220 = sst [smem:[#allocation6_spill]] %s1747_s18  ;;  %s1455_s26 = sadd.s32 4294967295, %s1775_s25   ;;  %s1775_s25 = sphi %s1886_s25, %s28_s25   ;;  %s1771_s24 = sphi %s1884_s24, %s2264_s24   ;;  %s1767_s23 = sphi %s1882_s23, %s2263_s23   ;;  %s1763_s22 = sphi %s1880_s22, %s2262_s22   ;;  %s1759_s21 = sphi %s1878_s21, %s2261_s21   ;;  %s1755_s20 = sphi %s1876_s20, %s2260_s20   ;;  %s1751_s19 = sphi %s1874_s19, %s2259_s19   ;;  %s1747_s18 = sphi %s1872_s18, %s2258_s18  }
   0xf   : > { %2221 = sst [smem:[#allocation7_spill]] %s1751_s19  ;;  %s1456_s27 = sadd.s32 4294967294, %s1775_s25  }
  0x10   : > { %2222 = sst [smem:[#allocation8_spill]] %s1755_s20  ;;  %s37_s28 = sadd.s32 1, %s1767_s23 }
  0x11   : > { %2223 = sst [smem:[#allocation9_spill]] %s1759_s21  ;;  %p38_p0 = scmp.ge.s32.totalorder %s37_s28, 2 }
  0x12   : > { %2224 = sst [smem:[#allocation10_spill]] %s1763_s22  ;;  %s40_s29 = sadd.s32 1, %s1771_s24 }
  0x13   : > { %2225 = sst [smem:[#allocation11_spill]] %s1767_s23  ;;  %p437_p1 = scmp.ne.s32.totalorder %s1755_s20, %s1751_s19 }
  0x14   : > { %2226 = sst [smem:[#allocation12_spill]] %s1771_s24  ;;  %p438_p2 = scmp.eq.s32.totalorder %s1455_s26, 3 }
  0x15   : > { %2227 = sst [smem:[#allocation13_spill]] %s1775_s25  ;;  %s2266_s28 = smov (%p38_p0, %s37_s28), 0 }
  0x16   : > { %2228 = sst [smem:[#allocation14_spill]] %s2266_s28  ;;  %s2268_s29 = smov (!%p38_p0, %s40_s29), %s1771_s24 }
  0x17   : > { %p1921_p3 = por %p438_p2, %p437_p1  ;;  %p443_p4 = scmp.ne.s32.totalorder %s1751_s19, %s1747_s18 }
  0x18   : > { %p42_p5 = scmp.ge.s32.totalorder %s2268_s29, 2  ;;  %p444_p6 = scmp.eq.s32.totalorder %s1456_s27, 3 }
  0x19   : > { %s2229_s30 = scalar_select %p1921_p3, 1, 0 }
  0x1a   : > { %p1459_p7 = scmp.ge.s32.totalorder %s1775_s25, 1  ;;  %p555_p8 = scmp.lt.s32.totalorder %s1775_s25, 5 }
  0x1b   : > { %2230 = sst [smem:[#allocation15_spill]] %s2229_s30  ;;  %s2270_s29 = smov (%p42_p5, %s2268_s29), 0 }
  0x1c   : > { %2231 = sst [smem:[#allocation16_spill]] %s2270_s29  ;;  %p1931_p9 = por %p444_p6, %p443_p4 }
  0x1d   : > { %p556_p10 = pnand %p1459_p7, %p555_p8  ;;  %s424_s17 = ssub.s32 %s1771_s24, %s2270_s29 }
  0x1e   : > { %s2232_s16 = scalar_select %p1931_p9, 1, 0 }
  0x1f   : > { %s427_s26 = sadd.s32 1, %s1755_s20  ;;  %p425_p11 = scmp.eq.s32.totalorder %s424_s17, 0 }
  0x20   : > { %2233 = sst [smem:[#allocation17_spill]] %s2232_s16  ;;  %559 = sbr.rel (%p556_p10) target bundleno = 2389 (0x955), region = 80 }
  0x21   : > { %s1939_s28 = scalar_select %p425_p11, %s1755_s20, %s427_s26  }
  0x22   : > { %s2202_s27 = sand.u32 (!%p556_p10), 1, %s1751_s19   ;;  %p646_p12 = scmp.lt.s32.totalorder (!%p556_p10), %s1763_s22, 1 }
  0x23   : > { %2234 = sst [smem:[#allocation18_spill]] %s1939_s28  ;;  %s1460_s23 = sshll.u32 (!%p556_p10), %s2202_s27, 3 }
  0x24   : > { %p650_p13 = scmp.lt.s32.totalorder (!%p556_p10), %s1759_s21, 1  ;;  %s2235_s0 = sld [smem:[#allocation19_spill]] (!%p556_p10) }
  0x25   : > { %s647_s18 = scalar_select %p646_p12, %s1763_s22, 1 }
  0x26   : > { %s1948_s16 = scalar_select %p650_p13, %s1759_s21, 1 }
  0x27   : > { %s1461_s17 = sshll.u32 %s647_s18, 3  ;;  %s2236_s5 = sld [smem:[#allocation22_spill]] }
  0x28   : > { %s1543_s19 = sshll.u32 %s1948_s16, 4  ;;  %s2237_s7 = sld [smem:[#allocation23_spill]] }
  0x29   : > { %s1991_s18 = scalar_lea.vmem %s2192_s11, %s1543_s19  ;;  %s685_s13 = scalar_lea.vmem %s2193_s12, %s1948_s16 }
  0x2a   : > { %s649_s24 = scalar_lea.vmem %s2235_s0, %s1461_s17  ;;  %s677_s0 = scalar_lea.vmem %s2191_s10, %s1948_s16 }
  0x2b   : > { %s693_s15 = scalar_lea.vmem %s2195_s14, %s1948_s16  ;;  %s2239_s20 = sld [smem:[#allocation25_spill]] }
  0x2c   : > { %s2007_s2 = scalar_lea.vmem [#allocation3], %s1460_s23  ;;  %s2240_s22 = sld [smem:[#allocation9_spill]] }
  0x2d   : > { %s1965_s1 = scalar_lea.vmem %s2236_s5, %s1543_s19 }
  0x2e   : > { %s1974_s26 = scalar_lea.vmem %s2237_s7, %s1543_s19  ;;  %s1546_s7 = sshll.u32 %s1948_s16, 6 }
  0x31   : > { %s2005_s9 = scalar_lea.vmem %s2239_s20, %s1546_s7 }
  0x32   : > { %p1470_p0 = scmp.ne.s32.totalorder %s2240_s22, 0 }
  0x33   : > { %s2241_s21 = sld [smem:[#allocation20_spill]] (!%p1470_p0) }
  0x34   : > { %698 = sbr.rel (%p1470_p0) target bundleno = 62 (0x3e), region = 84 }
  0x39   : > { %v699_v0 = vld [vmem:[%s649_s24] sm:$0xff]  ;;  %vm702_vm0 = vcmask 261120  }
  0x3a   : > { %v700_v1 = vld [vmem:[%s2241_s21] sm:$0xff] }
  0x3b   : > { %v701_v2 = vadd.f32 %v700_v1, %v699_v0 }
  0x3d   : > { %703 = vst.msk [vmem:[%s2007_s2] sm:$0xff] %vm702_vm0, %v701_v2 }
  0x3e PF: > { %vm707_vm1 = vcmask 261120   ;;  %v1777_v5 = vmov 32.0   ;;  %v1548_v17 = vld [vmem:[%s1965_s1 + $0x8] sm:$0xff]  ;;  %v1547_v18 = vld [vmem:[%s1965_s1] sm:$0xff]  ;;  %s2242_s1 = scalar_lea.vmem %s2184_s3, %s1948_s16  ;;  %s2243_s29 = scalar_lea.vmem %s2185_s4, %s1948_s16  ;;  %vm826_vm6 = vcmask 1043456   ;;  %vm787_vm7 = vcmask 64512  }
  0x3f   : > { %1655 = vrcp.f32 %v1777_v5  ;;  %775 = vmatpush.bf16.msra.mxu0 %v1548_v17  ;;  %v1647_v28 = vld [vmem:[%s2242_s1] ss:$0 sm:$0xff]  ;;  %s2244_s27 = scalar_lea.vmem %s2187_s6, %s1948_s16  ;;  %s1778_s30 = smov 88   ;;  %vm906_vm8 = vcmask 130112   ;;  %vm970_vm9 = vcmask 195712   ;;  %vm1034_vm10 = vcmask 261312  }
  0x40   : > { %v1648_v31 = vld [vmem:[%s2243_s29] ss:$0 sm:$0xff]  ;;  %s1779_s25 = smov 64   ;;  %s1780_s22 = smov 96  }
  0x41   : > { %v1649_v35 = vld [vmem:[%s2244_s27] ss:$0 sm:$0xff]  ;;  %s1781_s5 = smov 72   ;;  %s1782_s19 = smov 80  }
  0x42   : > { %s2245_s20 = sld [smem:[#allocation21_spill]]  ;;  %s1783_s1 = smov 120  }
  0x43   : > { %776 = vmatpush.bf16.msra.mxu0 %v1547_v18  ;;  %s1784_s23 = smov 104   ;;  %s1785_s24 = smov 112  }
  0x44   : > { %v2015_v3 = vld [vmem:[%s2007_s2] sm:$0xff]  ;;  %s1786_s29 = smov 40   ;;  %s1787_s17 = smov 48  }
  0x45   : > { %v708_v4 = vsel %vm707_vm1, %v2015_v3, 0.0  ;;  %v1656_v6 = vpop.eup %1655  ;;  %s1788_s28 = smov 56   ;;  %s1789_s27 = smov 16  }
  0x46   : > { %709 = vadd.xlane.f32.xlu0 %v708_v4  ;;  %v712_v7 = vmul.f32 32.0, %v1656_v6  ;;  %vm716_vm2 = vweird.f32 %v1656_v6  ;;  %s2247_s21 = sld [smem:[#allocation24_spill]] }
  0x48   : > { %v713_v8 = vsub.f32 1.0, %v712_v7  ;;  %v782_v51 = vld [vmem:[%s2245_s20] sm:$0xff] }
  0x4a   : > { %v714_v9 = vmul.f32 %v1656_v6, %v713_v8 }
  0x4c   : > { %v715_v10 = vadd.f32 %v1656_v6, %v714_v9  ;;  %s2248_s7 = scalar_lea.vmem %s2247_s21, %s1948_s16 }
  0x4e   : > { %v2019_v11 = vsel %vm716_vm2, %v1656_v6, %v715_v10 }
  0xb9   : > { %v710_v12 = vpop.xlane.xlu0 %709 }
  0xba   : > { %v718_v13 = vmul.f32 %v2019_v11, %v710_v12 }
  0xbc   : > { %v719_v14 = vsub.f32 %v2015_v3, %v718_v13 }
  0xbe   : > { %v720_v15 = vmul.f32 %v719_v14, %v719_v14 }
  0xc0   : > { %v721_v16 = vsel %vm707_vm1, %v720_v15, 0.0 }
  0xc1   : > { %722 = vadd.xlane.f32.xlu0 %v721_v16 }
 0x134   : > { %v723_v19 = vpop.xlane.xlu0 %722 }
 0x135   : > { %v724_v20 = vmul.f32 %v723_v19, %v2019_v11 }
 0x137   : > { %v725_v21 = vadd.f32 1e-05, %v724_v20 }
 0x139   : > { %1657 = vrsqrt.f32 %v725_v21  ;;  %vm732_vm4 = vweird.f32 %v725_v21 }
 0x13f   : > { %v1658_v22 = vpop.eup %1657 }
 0x140   : > { %v727_v23 = vmul.f32 %v1658_v22, %v725_v21  ;;  %vm733_vm3 = vweird.f32 %v1658_v22 }
 0x141   : > { %vm734_vm5 = vmor %vm732_vm4, %vm733_vm3 }
 0x142   : > { %v728_v24 = vmul.f32 %v1658_v22, %v727_v23 }
 0x144   : > { %v729_v25 = vmul.f32 0.5, %v728_v24 }
 0x146   : > { %v730_v26 = vsub.f32 1.5, %v729_v25 }
 0x148   : > { %v731_v27 = vmul.f32 %v1658_v22, %v730_v26 }
 0x14a   : > { %v735_v29 = vsel %vm734_vm5, %v1658_v22, %v731_v27 }
 0x14b   : > { %v736_v30 = vmul.f32 %v735_v29, %v719_v14 }
 0x14d   : > { %v740_v32 = vmul.f32 %v1647_v28, %v736_v30 }
 0x14f   : > { %v744_v33 = vadd.f32 %v1648_v31, %v740_v32 }
 0x151   : > { %v745_v34 = vpack.c.bf16 %v744_v33, %v744_v33 }
 0x153   : > { %1479 = vmatmul.msk.bf16.vlgmr.msra.gmra.mxu0 %vm707_vm1, %v745_v34 }
 0x1d0   : > { %v778_v36 = vpop.f32.mrf.mxu0 }
 0x1d1   : > { %v779_v37 = vadd.f32 %v1649_v35, %v778_v36 }
 0x1d3   : > { %v2043_v38 = vpack.c.bf16 %v779_v37, %v779_v37 }
 0x1d5   : > { %846 = vrot.lane.b32.xlu0 %v2043_v38, %s1778_s30  ;;  %821 = vrot.lane.b32.xlu2 %v2043_v38, %s1779_s25  ;;  %s1790_s30 = smov 8   ;;  %s1791_s25 = smov 24  }
 0x1d6   : > { %785 = vrot.lane.b32.xlu1 %v2043_v38, %s1780_s22 }
 0x1d8   : > { %v780_v39 = vpop.f32.mrf.mxu0 }
 0x1dd   : > { %974 = vrot.lane.b32.xlu0 %v2043_v38, %s1781_s5 }
 0x1e5   : > { %910 = vrot.lane.b32.xlu0 %v2043_v38, %s1782_s19  ;;  %s2246_s19 = scalar_lea.vmem %s2189_s8, %s1948_s16 }
 0x22f   : > { %v822_v40 = vpop.permute.xlu2 %821 }
 0x230   : > { %v828_v41 = vsel %vm826_vm6, %v822_v40, 0 }
 0x231   : > { %837 = vmatpush.bf16.msra.mxu2 %v828_v41 }
 0x247   : > { %v847_v42 = vpop.permute.xlu0 %846 }
 0x248   : > { %v786_v43 = vpop.permute.xlu1 %785  ;;  %v852_v44 = vsel %vm787_vm7, %v847_v42, 0 }
 0x249   : > { %v792_v45 = vsel %vm787_vm7, %v786_v43, 0  ;;  %861 = vmatpush.bf16.xpose.msrb.mxu2 %v852_v44 }
 0x24a   : > { %801 = vmatpush.bf16.xpose.msra.mxu1 %v792_v45 }
 0x24f   : > { %v975_v46 = vpop.permute.xlu0 %974 }
 0x250   : > { %v980_v47 = vsel %vm787_vm7, %v975_v46, 0 }
 0x251   : > { %1480 = vmatmul.msk.bf16.vlgmr.msra.gmra.mxu1 %vm787_vm7, %v2043_v38  ;;  %989 = vmatpush.bf16.xpose.msra.mxu3 %v980_v47 }
 0x257   : > { %v911_v48 = vpop.permute.xlu0 %910 }
 0x258   : > { %v916_v49 = vsel %vm787_vm7, %v911_v48, 0 }
 0x259   : > { %925 = vmatpush.bf16.xpose.msrb.mxu0 %v916_v49 }
 0x2ce   : > { %v803_v50 = vpop.f32.mrf.mxu1 }
 0x2cf   : > { %v807_v52 = vmul.f32 0.35355338, %v803_v50 }
 0x2d1   : > { %v808_v53 = vadd.f32 %v807_v52, %v782_v51 }
 0x2d3   : > { %v809_v54 = vsel %vm787_vm7, %v808_v53, -inf }
 0x2d4   : > { %810 = vmax.xlane.f32.xlu1 %v809_v54 }
 0x2d6   : > { %v805_v55 = vpop.f32.mrf.mxu1 }
 0x347   : > { %v811_v56 = vpop.xlane.xlu1 %810 }
 0x348   : > { %v812_v57 = vsub.f32 %v808_v53, %v811_v56 }
 0x34a   : > { %v813_v58 = vmul.f32 1.442695, %v812_v57 }
 0x34c   : > { %1659 = vpow2.f32 %v813_v58 }
 0x352   : > { %v1660_v59 = vpop.eup %1659 }
 0x353   : > { %v815_v60 = vsel %vm787_vm7, %v1660_v59, 0.0 }
 0x354   : > { %816 = vadd.xlane.f32.xlu2 %v815_v60 }
 0x36c   : > { %844 = vrot.lane.b32.xlu2 %v2043_v38, %s1783_s1 }
 0x374   : > { %972 = vrot.lane.b32.xlu2 %v2043_v38, %s1784_s23 }
 0x37c   : > { %908 = vrot.lane.b32.xlu2 %v2043_v38, %s1785_s24  ;;  %s2249_s24 = sld [smem:[#allocation10_spill]] }
 0x3c7   : > { %v817_v61 = vpop.xlane.xlu2 %816 }
 0x3c8   : > { %1661 = vrcp.f32 %v817_v61 }
 0x3ce   : > { %v1662_v62 = vpop.eup %1661 }
 0x3cf   : > { %v845_v63 = vpop.permute.xlu2 %844  ;;  %v819_v0 = vmul.f32 %v1662_v62, %v1660_v59  ;;  %v1550_v62 = vld [vmem:[%s1974_s26 + $0x8] sm:$0xff] }
 0x3d0   : > { %1067 = vmatpush.bf16.msra.mxu0 %v1550_v62  ;;  %v1654_v62 = vld [vmem:[%s693_s15] ss:$0 sm:$0xff] }
 0x3d1   : > { %v820_v1 = vpack.c.bf16 %v819_v0, %v819_v0 }
 0x3d3   : > { %1481 = vmatmul.msk.bf16.vlgmr.msra.gmra.mxu2 %vm787_vm7, %v820_v1  ;;  %v1549_v1 = vld [vmem:[%s1974_s26] sm:$0xff] }
 0x3d4   : > { %1068 = vmatpush.bf16.msra.mxu0 %v1549_v1 }
 0x3d7   : > { %v973_v2 = vpop.permute.xlu2 %972 }
 0x3d8   : > { %1486 = vmatmul.msk.bf16.vlgmr.msra.gmra.mxu3 %vm787_vm7, %v973_v2 }
 0x3df   : > { %v909_v4 = vpop.permute.xlu2 %908 }
 0x3e0   : > { %1484 = vmatmul.msk.bf16.vlgmr.msrb.gmra.mxu0 %vm787_vm7, %v909_v4 }
 0x3e3   : > { %1482 = vmatmul.msk.bf16.vlgmr.msrb.gmra.mxu2 %vm787_vm7, %v845_v63 }
 0x456   : > { %v839_v5 = vpop.f32.mrf.mxu2 }
 0x457   : > { %843 = vst.msk [vmem:[#allocation2] sm:$0xff] %vm787_vm7, %v839_v5 }
 0x45b   : > { %v991_v6 = vpop.f32.mrf.mxu3 }
 0x45c   : > { %v995_v7 = vmul.f32 0.35355338, %v991_v6  ;;  %v1650_v6 = vld [vmem:[%s2246_s19] ss:$0 sm:$0xff]  ;;  %s1262_s19 = sshll.u32 %s2007_s2, 4  ;;  %s1263_s19 = int_to_ptr.vmem [resolvable:$true] %s1262_s19 }
 0x45d   : > { %v927_v8 = vpop.f32.mrf.mxu0 }
 0x45e   : > { %v931_v9 = vmul.f32 0.35355338, %v927_v8  ;;  %v841_v10 = vpop.f32.mrf.mxu2  ;;  %v996_v12 = vadd.f32 %v995_v7, %v782_v51 }
 0x460   : > { %v997_v13 = vsel %vm787_vm7, %v996_v12, -inf  ;;  %v932_v14 = vadd.f32 %v931_v9, %v782_v51 }
 0x461   : > { %998 = vmax.xlane.f32.xlu0 %v997_v13 }
 0x462   : > { %v933_v15 = vsel %vm787_vm7, %v932_v14, -inf }
 0x463   : > { %v993_v16 = vpop.f32.mrf.mxu3  ;;  %934 = vmax.xlane.f32.xlu2 %v933_v15 }
 0x465   : > { %v929_v17 = vpop.f32.mrf.mxu0 }
 0x466   : > { %v863_v18 = vpop.f32.mrf.mxu2 }
 0x467   : > { %v867_v19 = vmul.f32 0.35355338, %v863_v18  ;;  %v1552_v18 = vld [vmem:[%s1991_s18 + $0x8] sm:$0xff] }
 0x469   : > { %v868_v20 = vadd.f32 %v867_v19, %v782_v51  ;;  %v1551_v19 = vld [vmem:[%s1991_s18] sm:$0xff] }
 0x46b   : > { %v869_v21 = vsel %vm787_vm7, %v868_v20, -inf }
 0x46c   : > { %870 = vmax.xlane.f32.xlu1 %v869_v21 }
 0x46e   : > { %v865_v22 = vpop.f32.mrf.mxu2 }
 0x47b   : > { %1009 = vrot.lane.b32.xlu2 %v2043_v38, %s1786_s29 }
 0x4d4   : > { %v999_v33 = vpop.xlane.xlu0 %998 }
 0x4d5   : > { %v1000_v34 = vsub.f32 %v996_v12, %v999_v33 }
 0x4d6   : > { %v935_v23 = vpop.xlane.xlu2 %934 }
 0x4d7   : > { %v936_v24 = vsub.f32 %v932_v14, %v935_v23  ;;  %v1001_v35 = vmul.f32 1.442695, %v1000_v34  ;;  %v1560_v34 = vld [vmem:[%s2005_s9 + $0x38] sm:$0xff] }
 0x4d8   : > { %1234 = vmatpush.bf16.msrb.mxu3 %v1560_v34 }
 0x4d9   : > { %v937_v25 = vmul.f32 1.442695, %v936_v24 }
 0x4db   : > { %1663 = vpow2.f32 %v937_v25 }
 0x4de   : > { %v1010_v46 = vpop.permute.xlu2 %1009 }
 0x4df   : > { %v871_v26 = vpop.xlane.xlu1 %870  ;;  %v1015_v50 = vsel %vm826_vm6, %v1010_v46, 0 }
 0x4e0   : > { %v872_v27 = vsub.f32 %v868_v20, %v871_v26 }
 0x4e1   : > { %v1664_v28 = vpop.eup %1663 }
 0x4e2   : > { %v873_v29 = vmul.f32 1.442695, %v872_v27  ;;  %v939_v30 = vsel %vm787_vm7, %v1664_v28, 0.0 }
 0x4e3   : > { %940 = vadd.xlane.f32.xlu0 %v939_v30  ;;  %v1652_v30 = vld [vmem:[%s677_s0] ss:$0 sm:$0xff] }
 0x4e4   : > { %1665 = vpow2.f32 %v873_v29 }
 0x4e5   : > { %1667 = vpow2.f32 %v1001_v35  ;;  %v1559_v35 = vld [vmem:[%s2005_s9 + $0x30] sm:$0xff] }
 0x4e6   : > { %1235 = vmatpush.bf16.msrb.mxu3 %v1559_v35 }
 0x4ea   : > { %v1666_v31 = vpop.eup %1665 }
 0x4eb   : > { %v875_v32 = vsel %vm787_vm7, %v1666_v31, 0.0  ;;  %v1668_v36 = vpop.eup %1667 }
 0x4ec   : > { %876 = vadd.xlane.f32.xlu1 %v875_v32  ;;  %v1003_v37 = vsel %vm787_vm7, %v1668_v36, 0.0 }
 0x4f7   : > { %945 = vrot.lane.b32.xlu0 %v2043_v38, %s1787_s17 }
 0x505   : > { %881 = vrot.lane.b32.xlu1 %v2043_v38, %s1788_s28 }
 0x52f   : > { %1004 = vadd.xlane.f32.xlu1 %v1003_v37  ;;  %v1557_v37 = vld [vmem:[%s2005_s9 + $0x20] sm:$0xff] }
 0x556   : > { %v941_v39 = vpop.xlane.xlu0 %940 }
 0x557   : > { %1669 = vrcp.f32 %v941_v39  ;;  %v1556_v39 = vld [vmem:[%s2005_s9 + $0x18] sm:$0xff] }
 0x55d   : > { %v1670_v40 = vpop.eup %1669 }
 0x55e   : > { %v943_v41 = vmul.f32 %v1670_v40, %v1664_v28  ;;  %v1651_v28 = vld [vmem:[%s2248_s7] ss:$0 sm:$0xff]  ;;  %v1555_v40 = vld [vmem:[%s2005_s9 + $0x10] sm:$0xff] }
 0x55f   : > { %v877_v43 = vpop.xlane.xlu1 %876 }
 0x560   : > { %v944_v45 = vpack.c.bf16 %v943_v41, %v943_v41  ;;  %1671 = vrcp.f32 %v877_v43  ;;  %v1554_v41 = vld [vmem:[%s2005_s9 + $0x8] sm:$0xff] }
 0x566   : > { %v1672_v38 = vpop.eup %1671 }
 0x567   : > { %v879_v47 = vmul.f32 %v1672_v38, %v1666_v31 }
 0x569   : > { %v946_v42 = vpop.permute.xlu0 %945  ;;  %v880_v51 = vpack.c.bf16 %v879_v47, %v879_v47 }
 0x56a   : > { %v951_v44 = vsel %vm826_vm6, %v946_v42, 0  ;;  %v1653_v42 = vld [vmem:[%s685_s13] ss:$0 sm:$0xff]  ;;  %s1540_s13 = sshll.u32 %s2249_s24, 3 }
 0x56b   : > { %960 = vmatpush.bf16.msrb.mxu1 %v951_v44  ;;  %v1553_v44 = vld [vmem:[%s2005_s9] sm:$0xff] }
 0x56e   : > { %1485 = vmatmul.msk.bf16.vlgmr.msrb.gmra.mxu1 %vm787_vm7, %v944_v45 }
 0x56f   : > { %1137 = vmatpush.bf16.msra.mxu1 %v1552_v18 }
 0x573   : > { %1138 = vmatpush.bf16.msra.mxu1 %v1551_v19 }
 0x577   : > { %v882_v48 = vpop.permute.xlu1 %881 }
 0x578   : > { %v887_v49 = vsel %vm826_vm6, %v882_v48, 0 }
 0x579   : > { %896 = vmatpush.bf16.msra.mxu2 %v887_v49 }
 0x57c   : > { %1483 = vmatmul.msk.bf16.vlgmr.msra.gmra.mxu2 %vm787_vm7, %v880_v51 }
 0x57d   : > { %1024 = vmatpush.bf16.msrb.mxu2 %v1015_v50 }
 0x5a2   : > { %v1005_v52 = vpop.xlane.xlu1 %1004 }
 0x5a3   : > { %1673 = vrcp.f32 %v1005_v52 }
 0x5a9   : > { %v1674_v53 = vpop.eup %1673 }
 0x5aa   : > { %v1007_v54 = vmul.f32 %v1674_v53, %v1668_v36  ;;  %v1558_v36 = vld [vmem:[%s2005_s9 + $0x28] sm:$0xff]  ;;  %s2250_s9 = sld [smem:[#allocation7_spill]] }
 0x5ab   : > { %1236 = vmatpush.bf16.msrb.mxu3 %v1558_v36 }
 0x5ac   : > { %v1008_v55 = vpack.c.bf16 %v1007_v54, %v1007_v54 }
 0x5ae   : > { %1487 = vmatmul.msk.bf16.vlgmr.msrb.gmra.mxu2 %vm787_vm7, %v1008_v55 }
 0x5af   : > { %1237 = vmatpush.bf16.msrb.mxu3 %v1557_v37 }
 0x5b0   : > { %s2254_s18 = sand.u32 1, %s2250_s9  }
 0x5b1   : > { %s1250_s21 = scalar_lea.sflag [#allocation4], %s2254_s18 }
 0x5b3   : > { %1238 = vmatpush.bf16.msrb.mxu3 %v1556_v39 }
 0x5b7   : > { %1239 = vmatpush.bf16.msrb.mxu3 %v1555_v40 }
 0x5bb   : > { %1240 = vmatpush.bf16.msrb.mxu3 %v1554_v41 }
 0x5bf   : > { %1241 = vmatpush.bf16.msrb.mxu3 %v1553_v44 }
 0x5eb   : > { %v962_v56 = vpop.f32.mrf.mxu1 }
 0x5ec   : > { %967 = vrot.lane.b32.xlu0 %v962_v56, %s1789_s27 }
 0x5f3   : > { %v964_v57 = vpop.f32.mrf.mxu1 }
 0x5ff   : > { %v898_v58 = vpop.f32.mrf.mxu2 }
 0x600   : > { %903 = vrot.lane.b32.xlu2 %v898_v58, %s1790_s30 }
 0x607   : > { %v900_v59 = vpop.f32.mrf.mxu2 }
 0x631   : > { %v1026_v60 = vpop.f32.mrf.mxu2 }
 0x632   : > { %1031 = vrot.lane.b32.xlu2 %v1026_v60, %s1791_s25  ;;  %s2252_s25 = sld [smem:[#allocation26_spill]] }
 0x638   : > { %s2253_s5 = smov %s2252_s25  ;;  %s1260_s22 = scalar_lea.hbm %s2252_s25, %s1540_s13 }
 0x639   : > { %v1028_v61 = vpop.f32.mrf.mxu2  ;;  %s1264_s26 = sshll.u32 %s1260_s22, 4  ;;  %s1701_s1 = scalar_lea.hbm %s2253_s5, 16  ;;  %s1265_s26 = int_to_ptr.hbm [resolvable:$true] %s1264_s26 }
 0x63a   : > { %s1695_s7 = sshra.s32 %s1265_s26, 4  ;;  %s1696_s7 = int_to_ptr.hbm [resolvable:$true] %s1695_s7 }
 0x63b   : > { %s1697_s16 = scalar_lea.hbm %s1696_s7, 8  ;;  %p1702_p5 = scmp.lt.s32.totalorder %s1696_s7, %s2253_s5 }
 0x63c   : > { %p1698_p1 = scmp.ne.s32.totalorder %s1696_s7, %s1697_s16  ;;  %p1703_p6 = scmp.lt.s32.totalorder %s1701_s1, %s1697_s16 }
 0x63e   : > { %p1699_p2 = pnand %p1698_p1, %p1921_p3  ;;  %p1704_p7 = por %p1703_p6, %p1702_p5 }
 0x640   : > { %p1700_p4 = pneg %p1699_p2 }
 0x642   : > { %p1705_p8 = pnand %p1704_p7, %p1700_p4 }
 0x65a   : > { %v904_v63 = vpop.permute.xlu2 %903 }
 0x65b   : > { %907 = vst.msk [vmem:[#allocation2] sm:$0xff] %vm906_vm8, %v904_v63 }
 0x65e   : > { %v968_v0 = vpop.permute.xlu0 %967 }
 0x65f   : > { %971 = vst.msk [vmem:[#allocation2] sm:$0xff] %vm970_vm9, %v968_v0 }
 0x68c   : > { %v1032_v2 = vpop.permute.xlu2 %1031 }
 0x68d   : > { %1035 = vst.msk [vmem:[#allocation2] sm:$0xff] %vm1034_vm10, %v1032_v2 }
 0x694   : > { %v1036_v4 = vld [vmem:[#allocation2] sm:$0xff] }
 0x695   : > { %v1037_v5 = vpack.c.bf16 %v1036_v4, %v1036_v4 }
 0x697   : > { %1496 = vmatmul.msk.bf16.vlgmr.msra.gmra.mxu0 %vm707_vm1, %v1037_v5 }
 0x714   : > { %v1070_v7 = vpop.f32.mrf.mxu0 }
 0x715   : > { %v1071_v8 = vadd.f32 %v1650_v6, %v1070_v7 }
 0x717   : > { %v2094_v9 = vadd.f32 %v1071_v8, %v2015_v3 }
 0x719   : > { %v1077_v10 = vsel %vm707_vm1, %v2094_v9, 0.0 }
 0x71a   : > { %1078 = vadd.xlane.f32.xlu0 %v1077_v10 }
 0x71c   : > { %v1072_v12 = vpop.f32.mrf.mxu0 }
 0x78d   : > { %v1079_v13 = vpop.xlane.xlu0 %1078 }
 0x78e   : > { %v1080_v14 = vmul.f32 %v1079_v13, %v2019_v11 }
 0x790   : > { %v1081_v15 = vsub.f32 %v2094_v9, %v1080_v14 }
 0x792   : > { %v1082_v16 = vmul.f32 %v1081_v15, %v1081_v15 }
 0x794   : > { %v1083_v17 = vsel %vm707_vm1, %v1082_v16, 0.0 }
 0x795   : > { %1084 = vadd.xlane.f32.xlu1 %v1083_v17 }
 0x808   : > { %v1085_v3 = vpop.xlane.xlu1 %1084 }
 0x809   : > { %v1086_v20 = vmul.f32 %v1085_v3, %v2019_v11 }
 0x80b   : > { %v1087_v21 = vadd.f32 1e-05, %v1086_v20 }
 0x80d   : > { %1675 = vrsqrt.f32 %v1087_v21  ;;  %vm1094_vm12 = vweird.f32 %v1087_v21 }
 0x813   : > { %v1676_v22 = vpop.eup %1675 }
 0x814   : > { %v1089_v23 = vmul.f32 %v1676_v22, %v1087_v21  ;;  %vm1095_vm11 = vweird.f32 %v1676_v22 }
 0x815   : > { %vm1096_vm13 = vmor %vm1094_vm12, %vm1095_vm11 }
 0x816   : > { %v1090_v24 = vmul.f32 %v1676_v22, %v1089_v23 }
 0x818   : > { %v1091_v25 = vmul.f32 0.5, %v1090_v24 }
 0x81a   : > { %v1092_v26 = vsub.f32 1.5, %v1091_v25 }
 0x81c   : > { %v1093_v27 = vmul.f32 %v1676_v22, %v1092_v26 }
 0x81e   : > { %v1097_v11 = vsel %vm1096_vm13, %v1676_v22, %v1093_v27 }
 0x81f   : > { %v1098_v29 = vmul.f32 %v1097_v11, %v1081_v15 }
 0x821   : > { %v1102_v31 = vmul.f32 %v1651_v28, %v1098_v29 }
 0x823   : > { %v1106_v32 = vadd.f32 %v1652_v30, %v1102_v31 }
 0x825   : > { %v1107_v33 = vpack.c.bf16 %v1106_v32, %v1106_v32 }
 0x827   : > { %1505 = vmatmul.msk.bf16.vlgmr.msra.gmra.mxu1 %vm707_vm1, %v1107_v33 }
 0x8a4   : > { %v1140_v43 = vpop.f32.mrf.mxu1 }
 0x8a5   : > { %v1141_v45 = vadd.f32 %v1653_v42, %v1140_v43 }
 0x8a7   : > { %v1506_v38 = vmul.f32 -1.702, %v1141_v45 }
 0x8a9   : > { %v1146_v46 = vmul.f32 1.442695, %v1506_v38 }
 0x8ab   : > { %1677 = vpow2.f32 %v1146_v46 }
 0x8ac   : > { %v1142_v47 = vpop.f32.mrf.mxu1 }
 0x8b1   : > { %v1678_v48 = vpop.eup %1677 }
 0x8b2   : > { %v1148_v49 = vadd.f32 1.0, %v1678_v48 }
 0x8b4   : > { %1679 = vrcp.f32 %v1148_v49  ;;  %v1160_v53 = vand.u32 2147483648, %v1148_v49  ;;  %v1158_v55 = vand.u32 2147483647, %v1148_v49  ;;  %vm1154_vm15 = vweird.f32 %v1148_v49 }
 0x8b6   : > { %v1161_v57 = vor.u32 1.1754944e-38, %v1160_v53  ;;  %vm1159_vm2 = vcmp.eq.f32.partialorder %v1158_v55, 8.507059e+37 }
 0x8ba   : > { %v1680_v50 = vpop.eup %1679 }
 0x8bb   : > { %v1150_v51 = vmul.f32 %v1680_v50, %v1148_v49  ;;  %vm1155_vm14 = vweird.f32 %v1680_v50 }
 0x8bc   : > { %vm1156_vm0 = vmor %vm1154_vm15, %vm1155_vm14 }
 0x8bd   : > { %v1151_v52 = vsub.f32 1.0, %v1150_v51 }
 0x8bf   : > { %v1152_v54 = vmul.f32 %v1680_v50, %v1151_v52 }
 0x8c1   : > { %v1153_v56 = vadd.f32 %v1680_v50, %v1152_v54 }
 0x8c3   : > { %v1157_v58 = vsel %vm1156_vm0, %v1680_v50, %v1153_v56 }
 0x8c4   : > { %v1162_v59 = vsel %vm1159_vm2, %v1161_v57, %v1157_v58 }
 0x8c5   : > { %v1164_v60 = vmul.f32 %v1162_v59, %v1141_v45 }
 0x8c7   : > { %v1165_v61 = vpack.c.bf16 %v1164_v60, %v1164_v60 }
 0x8c9   : > { %1242 = vmatmul.bf16.vlgmr.msrb.gmra.mxu3 %v1165_v61 }
 0x94c   : > { %v1243_v63 = vpop.f32.mrf.mxu3 }
 0x94d   : > { %v1244_v0 = vadd.f32 %v1654_v62, %v1243_v63 }
 0x94f   : > { %v1247_v1 = vadd.f32 %v1244_v0, %v2094_v9 }
 0x951   : > { %1248 = vst.msk [vmem:[%s2007_s2] sm:$0xff] %vm707_vm1, %v1247_v1 }
 0x952   : > { %1708 = shalt.err (!%p1705_p8)
}
 0x953   : > { %1561 = dma.vmem_to_hbm [thread:$0]  (%p1921_p3), %s1263_s19, 128, %s1265_s26, %s1250_s21  }
 0x954   : > { %v1245_v2 = vpop.f32.mrf.mxu3 }
 0x955 PF: > { %s2255_s2 = sld [smem:[#allocation13_spill]] }
 0x956   : > { %s2256_s24 = sld [smem:[#allocation6_spill]] }
 0x95b   : > { %p1567_p10 = scmp.ge.s32.totalorder %s2255_s2, 2 }
 0x95c   : > { %s1276_s13 = sand.u32 1, %s2256_s24  }
 0x95d   : > { %p1564_p11 = pnand %p1567_p10, %p1931_p9  ;;  %s1277_s29 = scalar_lea.sflag [#allocation4], %s1276_s13 }
 0x95f   : > { %p1565_p12 = pneg %p1564_p11 }
 0x961   : > { %1742 = dma.done.wait (%p1565_p12), %s1277_s29, 128  }
 0x962   : > { %1744 = vsyncadd (%p1565_p12), %s1277_s29, 4294967168  ;;  %s28_s25 = sadd.s32 1, %s2255_s2   ;;  %s2258_s18 = sld [smem:[#allocation7_spill]] }
 0x963   : > { %p25_p13 = scmp.ge.s32.totalorder %s28_s25, 6   ;;  %s2259_s19 = sld [smem:[#allocation8_spill]] }
 0x964   : > { %s2260_s20 = sld [smem:[#allocation18_spill]] }
 0x965   : > { %s2261_s21 = sld [smem:[#allocation11_spill]]  ;;  %27 = sbr.rel (!%p25_p13) target bundleno = 14 (0xe), region = 155 }
 0x966   : > { %s2262_s22 = sld [smem:[#allocation12_spill]] }
 0x967   : > { %s2263_s23 = sld [smem:[#allocation14_spill]] }
 0x968   : > { %s2264_s24 = sld [smem:[#allocation16_spill]] }
 0x96a   :  { %1283 = vsyncpa [#allocation4], 1 }
 0x96b   :  { %1285 = vsyncpa [#allocation4 + $0x1], 1 }

</bundles_post_ra>
